<compile_context>
chip_gen: v7x
topology: tpu7x:2x2x1
jax: 0.10.0
libtpu: 0.0.40
codegen_flags: <defaults>
</compile_context>

<pallas_src>
import functools

import jax
import jax.numpy as jnp
from jax import lax
from jax.experimental import pallas as pl
from jax.experimental.pallas import tpu as pltpu

EPS = 1e-5
_LANES = 128
_MAX_BLOCK_ROWS = 16384


def _derive_vmem_budget():
    """Per-generation scoped-VMEM limit and per-tile byte target.

    Conservative fallback is v7x's 64 MiB physical VMEM per TensorCore; v5e/v6e
    (128 MiB) get a larger limit when the hardware query succeeds.
    """
    cap = 64 * 1024 * 1024
    try:
        info = pltpu.get_tpu_info()
        cap_q = getattr(info, "vmem_capacity_bytes", None)
        if cap_q:
            cap = int(cap_q)
    except Exception:
        pass
    limit = min((cap * 3) // 4, 100 * 1024 * 1024)
    # Footprint per grid step ~= 2x(in) + 2x(out) double buffers + ~5 tile-sized
    # f32 temporaries -> budget ~1/10 of the scoped limit per tile.
    target = max(1 << 20, limit // 10)
    target = min(target, 8 * 1024 * 1024)
    return int(target), int(limit)


_TARGET_TILE_BYTES, _VMEM_LIMIT_BYTES = _derive_vmem_budget()


# ----------------------------- kernels ------------------------------------ #

def _ln_kernel(x_ref, w_ref, b_ref, o_ref):
    # x_ref: (tm, H); w_ref/b_ref: (1, H) f32, resident across the grid.
    xf = x_ref[...].astype(jnp.float32)
    mean = jnp.mean(xf, axis=-1, keepdims=True)
    c = xf - mean
    var = jnp.mean(c * c, axis=-1, keepdims=True)   # biased var (F.layer_norm)
    y = c * lax.rsqrt(var + EPS) * w_ref[...]
    o_ref[...] = (y + b_ref[...]).astype(o_ref.dtype)


def _ln_kernel_nobias(x_ref, w_ref, o_ref):
    xf = x_ref[...].astype(jnp.float32)
    mean = jnp.mean(xf, axis=-1, keepdims=True)
    c = xf - mean
    var = jnp.mean(c * c, axis=-1, keepdims=True)
    o_ref[...] = (c * lax.rsqrt(var + EPS) * w_ref[...]).astype(o_ref.dtype)


def _packed_normalize(xf, seg_ref, inv_h):
    """Segmented layer-norm over 128-lane-packed rows using one MXU
    block-diagonal segment-sum per statistic (exact f32 via HIGHEST precision).
    seg_ref: (128, 128) f32 with S[j,k] = 1 iff j and k are in the same segment,
    so xf @ S broadcasts each per-segment sum back to every lane of the segment.
    """
    S = seg_ref[...]
    mean = jnp.dot(xf, S, preferred_element_type=jnp.float32,
                   precision=lax.Precision.HIGHEST) * inv_h
    c = xf - mean
    var = jnp.dot(c * c, S, preferred_element_type=jnp.float32,
                  precision=lax.Precision.HIGHEST) * inv_h
    return c * lax.rsqrt(var + EPS)


def _ln_packed_kernel(x_ref, w_ref, b_ref, seg_ref, o_ref, *, inv_h):
    y = _packed_normalize(x_ref[...].astype(jnp.float32), seg_ref, inv_h)
    o_ref[...] = (y * w_ref[...] + b_ref[...]).astype(o_ref.dtype)


def _ln_packed_kernel_nobias(x_ref, w_ref, seg_ref, o_ref, *, inv_h):
    y = _packed_normalize(x_ref[...].astype(jnp.float32), seg_ref, inv_h)
    o_ref[...] = (y * w_ref[...]).astype(o_ref.dtype)


# ----------------------------- wrapper ------------------------------------ #

def _pick_block_rows(rows, width, itemsize):
    """Largest row tile whose pipelined footprint stays within the VMEM budget.

    Sized by the f32 compute footprint (intermediates are always f32), aligned
    to the input dtype's sublane packing, and capped so the grid keeps >= 2
    blocks whenever possible (v7x megacore needs >1 grid step to use both TCs).
    """
    align = {4: 8, 2: 16, 1: 32}.get(itemsize, 8)
    row_bytes = max(1, width * max(itemsize, 4))       # f32 compute footprint
    br = max(1, _TARGET_TILE_BYTES // row_bytes)
    br = min(br, _MAX_BLOCK_ROWS)
    if rows >= 2 * align:
        br = min(br, pl.cdiv(rows, 2))                 # >= 2 grid steps (megacore)
    if br >= rows:
        return int(rows)                               # single full-extent block
    br = max(align, (br // align) * align)
    return int(br)


@functools.partial(jax.jit, static_argnames=("block_rows",))
def layer_norm(x, weight, bias=None, *, block_rows=None):
    """LayerNorm over the last axis of x (any leading shape), eps=1e-5.

    weight: (H,) scale. bias: (H,) shift or None (the module's bias=False case).
    Matches torch.nn.functional.layer_norm(input, (H,), weight, bias, 1e-5).
    """
    orig_shape = x.shape
    H = orig_shape[-1]
    rows = 1
    for d in orig_shape[:-1]:
        rows *= d
    x2 = x.reshape(rows, H)

    w_f32 = weight.astype(jnp.float32)
    b_f32 = None if bias is None else bias.astype(jnp.float32)
    itemsize = jnp.dtype(x.dtype).itemsize

    # Lane-packing for narrow hidden dims: G = 128 // H rows per 128-lane row.
    group = _LANES // H if (H < _LANES and _LANES % H == 0) else 1
    packed = group > 1

    if packed:
        rem = rows % group
        pad = (group - rem) % group
        if pad:
            # A few zero rows keep the lane-dense packed path; sliced off below.
            x2p = jnp.concatenate(
                [x2, jnp.zeros((pad, H), dtype=x2.dtype)], axis=0)
        else:
            x2p = x2
        rows_k, width = (rows + pad) // group, _LANES
        xk = x2p.reshape(rows_k, width)                  # contiguous reshape
        wk = jnp.tile(w_f32, group).reshape(1, width)
        bk = None if b_f32 is None else jnp.tile(b_f32, group).reshape(1, width)
        # Block-diagonal segment matrix for the MXU segment-sum.
        seg = jnp.arange(_LANES, dtype=jnp.int32) // H
        seg_mat = (seg[:, None] == seg[None, :]).astype(jnp.float32)
        base = _ln_packed_kernel if bk is not None else _ln_packed_kernel_nobias
        kern = functools.partial(base, inv_h=1.0 / float(H))
    else:
        pad = 0
        rows_k, width = rows, H
        xk = x2
        wk = w_f32.reshape(1, width)
        bk = None if b_f32 is None else b_f32.reshape(1, width)
        seg_mat = None
        kern = _ln_kernel if bk is not None else _ln_kernel_nobias

    br = block_rows if block_rows is not None else _pick_block_rows(
        rows_k, width, itemsize)
    grid = (pl.cdiv(rows_k, br),)   # ragged tail: rows independent, OOB writes dropped

    x_spec = pl.BlockSpec((br, width), lambda i: (i, 0))
    p_spec = pl.BlockSpec((1, width), lambda i: (0, 0))
    in_specs = [x_spec, p_spec]
    args = [xk, wk]
    if bk is not None:
        in_specs.append(p_spec)
        args.append(bk)
    if seg_mat is not None:
        in_specs.append(pl.BlockSpec((_LANES, _LANES), lambda i: (0, 0)))
        args.append(seg_mat)

    if packed:
        flops = 2 * 2 * rows_k * _LANES * _LANES + 6 * rows_k * _LANES
    else:
        flops = 8 * rows_k * width
    cost = pl.CostEstimate(
        flops=int(flops),
        transcendentals=int(rows_k * group),
        bytes_accessed=int(2 * rows_k * width * itemsize + 3 * width * 4),
    )

    out = pl.pallas_call(
        kern,
        out_shape=jax.ShapeDtypeStruct((rows_k, width), x.dtype),
        grid_spec=pltpu.PrefetchScalarGridSpec(
            num_scalar_prefetch=0,
            grid=grid,
            in_specs=in_specs,
            out_specs=pl.BlockSpec((br, width), lambda i: (i, 0)),
        ),
        compiler_params=pltpu.CompilerParams(
            dimension_semantics=("parallel",),
            vmem_limit_bytes=_VMEM_LIMIT_BYTES,
        ),
        cost_estimate=cost,
    )(*args)

    if packed:
        out = out.reshape(rows_k * group, H)
        if pad:
            out = out[:rows]
    return out.reshape(orig_shape)


# ----------------------------- reference / demo ---------------------------- #

def _ref_layer_norm(x, w, b):
    xf = x.astype(jnp.float32)
    mean = jnp.mean(xf, axis=-1, keepdims=True)
    var = jnp.mean((xf - mean) ** 2, axis=-1, keepdims=True)
    y = (xf - mean) / jnp.sqrt(var + EPS) * w.astype(jnp.float32)
    if b is not None:
        y = y + b.astype(jnp.float32)
    return y.astype(x.dtype)


if __name__ == "__main__":
    # Module config: ndim (hidden) = 32, bias = True.
    batch, seq, hidden = 2, 8, 32
    key = jax.random.PRNGKey(0)
    k1, k2, k3, k4 = jax.random.split(key, 4)

    x = jax.random.normal(k1, (batch, seq, hidden), dtype=jnp.float32)
    weight = jnp.ones((hidden,), dtype=jnp.float32)   # matches torch.ones(ndim)
    bias = jnp.zeros((hidden,), dtype=jnp.float32)    # matches torch.zeros(ndim)

    y = layer_norm(x, weight, bias)
    jax.block_until_ready(y)
    assert jnp.allclose(y, _ref_layer_norm(x, weight, bias),
                        atol=1e-5, rtol=1e-5), "mismatch (packed, module init)"

    # Non-trivial params, packed path, ragged row tile (25 packed rows, tile 8).
    w2 = jax.random.normal(k2, (hidden,), dtype=jnp.float32)
    b2 = jax.random.normal(k3, (hidden,), dtype=jnp.float32)
    x2 = jax.random.normal(k4, (2, 50, hidden), dtype=jnp.float32)
    y2 = layer_norm(x2, w2, b2, block_rows=8)
    jax.block_until_ready(y2)
    assert jnp.allclose(y2, _ref_layer_norm(x2, w2, b2),
                        atol=1e-5, rtol=1e-5), "mismatch (packed, ragged tile)"

    # rows % group != 0 -> row padding keeps the lane-dense packed path.
    x3 = jax.random.normal(k1, (3, 7, hidden), dtype=jnp.float32)
    y3 = layer_norm(x3, w2, b2)
    jax.block_until_ready(y3)
    assert jnp.allclose(y3, _ref_layer_norm(x3, w2, b2),
                        atol=1e-5, rtol=1e-5), "mismatch (packed, padded rows)"

    # bias=False config, H=128 (plain lane-dense path) with a ragged row tile.
    x4 = jax.random.normal(k2, (3, 7, 128), dtype=jnp.float32)
    w4 = jax.random.normal(k3, (128,), dtype=jnp.float32)
    y4 = layer_norm(x4, w4, None, block_rows=8)
    jax.block_until_ready(y4)
    assert jnp.allclose(y4, _ref_layer_norm(x4, w4, None),
                        atol=1e-5, rtol=1e-5), "mismatch (no-bias, ragged tile)"

    # bf16 input exercises the 16-row sublane alignment / f32-footprint sizing.
    x5 = jax.random.normal(k4, (4, 16, hidden), dtype=jnp.bfloat16)
    y5 = layer_norm(x5, w2, b2)
    jax.block_until_ready(y5)
    assert jnp.allclose(y5.astype(jnp.float32),
                        _ref_layer_norm(x5, w2, b2).astype(jnp.float32),
                        atol=3e-2, rtol=3e-2), "mismatch (bf16 packed)"

    print("KERNEL_OK")
</pallas_src>

<mosaic_0001>
module attributes {stable_mosaic.version = 11 : i64} {
  func.func @_ln_packed_kernel(%arg0: i32, %arg1: memref<4x128xf32, #tpu.memory_space<vmem>>, %arg2: memref<1x128xf32, #tpu.memory_space<vmem>>, %arg3: memref<1x128xf32, #tpu.memory_space<vmem>>, %arg4: memref<128x128xf32, #tpu.memory_space<vmem>>, %arg5: memref<4x128xf32, #tpu.memory_space<vmem>>) attributes {dimension_semantics = [#tpu.dimension_semantics<parallel>], iteration_bounds = array<i64: 1>, scalar_prefetch = 0 : i64, scratch_operands = 0 : i64, tpu.core_type = #tpu.core_type<tc>, window_params = [{transform_indices = @transform_0, window_bounds = array<i64: 4, 128>}, {pipeline_mode = #tpu.pipeline_mode<synchronous>, transform_indices = @transform_1, window_bounds = array<i64: 1, 128>}, {pipeline_mode = #tpu.pipeline_mode<synchronous>, transform_indices = @transform_2, window_bounds = array<i64: 1, 128>}, {pipeline_mode = #tpu.pipeline_mode<synchronous>, transform_indices = @transform_3, window_bounds = array<i64: 128, 128>}, {transform_indices = @transform_4, window_bounds = array<i64: 4, 128>}]} {
    %c0 = arith.constant 0 : index
    %c0_0 = arith.constant 0 : index
    %0 = vector.load %arg1[%c0, %c0_0] : memref<4x128xf32, #tpu.memory_space<vmem>>, vector<4x128xf32>
    %c0_1 = arith.constant 0 : index
    %c0_2 = arith.constant 0 : index
    %1 = vector.load %arg4[%c0_1, %c0_2] : memref<128x128xf32, #tpu.memory_space<vmem>>, vector<128x128xf32>
    %cst = arith.constant dense<0.000000e+00> : vector<4x128xf32>
    %2 = tpu.matmul %0, %1, %cst {dimension_numbers = #tpu.dot_dimension_numbers<[1], [0], [0], [1], [0, 0, 1, 1], [], []>, precision = #tpu.contract_precision<fp32>} : vector<4x128xf32>, vector<128x128xf32>, vector<4x128xf32> -> vector<4x128xf32>
    %cst_3 = arith.constant 3.125000e-02 : f32
    %3 = vector.broadcast %cst_3 : f32 to vector<4x128xf32>
    %4 = arith.mulf %2, %3 : vector<4x128xf32>
    %5 = arith.subf %0, %4 : vector<4x128xf32>
    %6 = arith.mulf %5, %5 : vector<4x128xf32>
    %cst_4 = arith.constant dense<0.000000e+00> : vector<4x128xf32>
    %7 = tpu.matmul %6, %1, %cst_4 {dimension_numbers = #tpu.dot_dimension_numbers<[1], [0], [0], [1], [0, 0, 1, 1], [], []>, precision = #tpu.contract_precision<fp32>} : vector<4x128xf32>, vector<128x128xf32>, vector<4x128xf32> -> vector<4x128xf32>
    %cst_5 = arith.constant 3.125000e-02 : f32
    %8 = vector.broadcast %cst_5 : f32 to vector<4x128xf32>
    %9 = arith.mulf %7, %8 : vector<4x128xf32>
    %cst_6 = arith.constant 9.99999974E-6 : f32
    %10 = vector.broadcast %cst_6 : f32 to vector<4x128xf32>
    %11 = arith.addf %9, %10 : vector<4x128xf32>
    %12 = math.rsqrt %11 : vector<4x128xf32>
    %13 = arith.mulf %5, %12 : vector<4x128xf32>
    %c0_7 = arith.constant 0 : index
    %c0_8 = arith.constant 0 : index
    %14 = vector.load %arg2[%c0_7, %c0_8] : memref<1x128xf32, #tpu.memory_space<vmem>>, vector<1x128xf32>
    %15 = vector.broadcast %14 : vector<1x128xf32> to vector<4x128xf32>
    %16 = arith.mulf %13, %15 : vector<4x128xf32>
    %c0_9 = arith.constant 0 : index
    %c0_10 = arith.constant 0 : index
    %17 = vector.load %arg3[%c0_9, %c0_10] : memref<1x128xf32, #tpu.memory_space<vmem>>, vector<1x128xf32>
    %18 = vector.broadcast %17 : vector<1x128xf32> to vector<4x128xf32>
    %19 = arith.addf %16, %18 : vector<4x128xf32>
    %c0_11 = arith.constant 0 : index
    %c0_12 = arith.constant 0 : index
    %20 = vector.load %arg5[%c0_11, %c0_12] : memref<4x128xf32, #tpu.memory_space<vmem>>, vector<4x128xf32>
    tpu.vector_store %arg5[%c0_11, %c0_12], %19 {strides = array<i32>} : memref<4x128xf32, #tpu.memory_space<vmem>>, vector<4x128xf32>,
    return
  }
  func.func @transform_0(%arg0: i32) -> (i32, i32) {
    %c0_i32 = arith.constant 0 : i32
    %c0_i32_0 = arith.constant 0 : i32
    return %arg0, %c0_i32 : i32, i32
  }
  func.func @transform_1(%arg0: i32) -> (i32, i32) {
    %c0_i32 = arith.constant 0 : i32
    %c0_i32_0 = arith.constant 0 : i32
    %c0_i32_1 = arith.constant 0 : i32
    return %c0_i32, %c0_i32_0 : i32, i32
  }
  func.func @transform_2(%arg0: i32) -> (i32, i32) {
    %c0_i32 = arith.constant 0 : i32
    %c0_i32_0 = arith.constant 0 : i32
    %c0_i32_1 = arith.constant 0 : i32
    return %c0_i32, %c0_i32_0 : i32, i32
  }
  func.func @transform_3(%arg0: i32) -> (i32, i32) {
    %c0_i32 = arith.constant 0 : i32
    %c0_i32_0 = arith.constant 0 : i32
    %c0_i32_1 = arith.constant 0 : i32
    return %c0_i32, %c0_i32_0 : i32, i32
  }
  func.func @transform_4(%arg0: i32) -> (i32, i32) {
    %c0_i32 = arith.constant 0 : i32
    %c0_i32_0 = arith.constant 0 : i32
    return %arg0, %c0_i32 : i32, i32
  }
}

</mosaic_0001>

<bundles_post_ra>
// kernel: tile.13
= control target key start
LH: loop header
LB: loop body
LE: loop exit
PB: predicated region body
PF: predicated region fallthrough
CT: control target
= control target key end

     0   :  { %s22_s0 = inlined_call_operand.vmem [shape: f32[32], index: 0, kind: input, shape index: {}]   ;;  %s23_s1 = inlined_call_operand.vmem [shape: f32[4,32], index: 1, kind: output, shape index: {}]  }
   0x1   :  { %v4_v0 = vld [vmem:[%s22_s0] ss:$0 sm:$0xff] }
   0x2   :  { %5 = vst [vmem:[%s23_s1] sm:$0xf] %v4_v0 }

// kernel: tile.14
= control target key start
LH: loop header
LB: loop body
LE: loop exit
PB: predicated region body
PF: predicated region fallthrough
CT: control target
= control target key end

     0   :  { %vm7_vm0 = vcmask 261120   ;;  %s37_s8 = smov 32   ;;  %s38_s9 = smov 64   ;;  %vm13_vm1 = vcmask 1048320   ;;  %vm19_vm2 = vcmask 785920   ;;  %vm25_vm3 = vcmask 523520   ;;  %s55_s0 = inlined_call_operand.vmem [shape: f32[4,32], index: 0, kind: input, shape index: {}]   ;;  %s56_s1 = inlined_call_operand.vmem [shape: f32[1,128], index: 1, kind: output, shape index: {}]  }
   0x1   :  { %v4_v0 = vld [vmem:[%s55_s0] sm:$0xf]  ;;  %s36_s0 = smov 96  }
   0x2   :  { %5 = vst [vmem:[#allocation1] sm:$0xf] %v4_v0 }
   0x9   :  { %v10_v1 = vld [vmem:[#allocation1 + $0x3] sm:$0x1]   ;;  %v22_v2 = vld [vmem:[#allocation1 + $0x1] sm:$0x1]   ;;  %v6_v3 = vld [vmem:[#allocation1] sm:$0x1]  }
   0xa   :  { %11 = vrot.lane.b32.xlu0 %v10_v1, %s36_s0  ;;  %23 = vrot.lane.b32.xlu1 %v22_v2, %s37_s8  ;;  %v16_v4 = vld [vmem:[#allocation1 + $0x2] sm:$0x1]   ;;  %8 = vst.msk [vmem:[#allocation0] sm:$0x1] %vm7_vm0, %v6_v3  }
   0xe   :  { %17 = vrot.lane.b32.xlu0 %v16_v4, %s38_s9 }
  0x7c   :  { %v12_v5 = vpop.permute.xlu0 %11   ;;  %v24_v6 = vpop.permute.xlu1 %23  }
  0x7d   :  { %14 = vst.msk [vmem:[#allocation0] sm:$0x1] %vm13_vm1, %v12_v5  }
  0x80   :  { %v18_v7 = vpop.permute.xlu0 %17  }
  0x81   :  { %20 = vst.msk [vmem:[#allocation0] sm:$0x1] %vm19_vm2, %v18_v7  }
  0x82   :  { %26 = vst.msk [vmem:[#allocation0] sm:$0x1] %vm25_vm3, %v24_v6  }
  0x89   :  { %v30_v8 = vld [vmem:[#allocation0] sm:$0x1] }
  0x8a   :  { %32 = vst [vmem:[%s56_s1] sm:$0x1] %v30_v8 }

// kernel: layer_norm.1
= control target key start
LH: loop header
LB: loop body
LE: loop exit
PB: predicated region body
PF: predicated region fallthrough
CT: control target
= control target key end

     0   :  { %v2283_v0 = vmov 0.0|0.0   ;;  %vm2284_vm0 = vmmov 0   ;;  %v2285_v4 = vmov 0.0   ;;  %s2762_s3 = inlined_call_operand.vmem [shape: f32[128,128], index: 3, kind: input, shape index: {}]   ;;  %s2763_s0 = inlined_call_operand.vmem [shape: f32[4,128], index: 0, kind: input, shape index: {}]   ;;  %s2764_s1 = inlined_call_operand.vmem [shape: f32[1,128], index: 1, kind: input, shape index: {}]   ;;  %s2765_s2 = inlined_call_operand.vmem [shape: f32[1,128], index: 2, kind: input, shape index: {}]   ;;  %s2766_s4 = inlined_call_operand.vmem [shape: f32[4,128], index: 4, kind: output, shape index: {}]  }
   0x1   :  { %1970 = vmatprep.subr.bf16.mxu0 %v2283_v0  ;;  %v18_v1 = vld [vmem:[%s2762_s3] sm:$0xff]  ;;  %v19_v2 = vld [vmem:[%s2762_s3 + $0x8] sm:$0xff]  ;;  %v20_v3 = vld [vmem:[%s2762_s3 + $0x10] sm:$0xff]  ;;  %1582 = vmatprep.mubr.msk.f32.mxu0 %vm2284_vm0, %v2285_v4 }
   0x2   :  { %v35_v5 = vand.u32 4294901760, %v18_v1  ;;  %v38_v6 = vand.u32 4294901760, %v19_v2  ;;  %v21_v7 = vld [vmem:[%s2762_s3 + $0x18] sm:$0xff]  ;;  %v41_v8 = vand.u32 4294901760, %v20_v3  ;;  %2114 = vmatprep.subr.bf16.mxu1 %v2283_v0  ;;  %1792 = vmatprep.mubr.msk.f32.mxu1 %vm2284_vm0, %v2285_v4  ;;  %v22_v10 = vld [vmem:[%s2762_s3 + $0x20] sm:$0xff]  ;;  %v23_v11 = vld [vmem:[%s2762_s3 + $0x28] sm:$0xff] }
   0x3   :  { %v44_v9 = vand.u32 4294901760, %v21_v7  ;;  %v47_v14 = vand.u32 4294901760, %v22_v10  ;;  %v50_v15 = vand.u32 4294901760, %v23_v11  ;;  %v24_v16 = vld [vmem:[%s2762_s3 + $0x30] sm:$0xff]  ;;  %v25_v17 = vld [vmem:[%s2762_s3 + $0x38] sm:$0xff]  ;;  %v26_v21 = vld [vmem:[%s2762_s3 + $0x40] sm:$0xff] }
   0x4   :  { %v2335_v12 = vpack.c.bf16 %v38_v6, %v35_v5  ;;  %v53_v19 = vand.u32 4294901760, %v24_v16  ;;  %v56_v20 = vand.u32 4294901760, %v25_v17  ;;  %v2358_v22 = vld [vmem:[%s2763_s0] sm:$0xf]  ;;  %v27_v23 = vld [vmem:[%s2762_s3 + $0x48] sm:$0xff]  ;;  %v28_v24 = vld [vmem:[%s2762_s3 + $0x50] sm:$0xff]  ;;  %v2390_v34 = vsub.f32 %v18_v1, %v35_v5 }
   0x5   :  { %v2338_v13 = vpack.c.bf16 %v44_v9, %v41_v8  ;;  %v2350_v18 = vpack.c.bf16 %v50_v15, %v47_v14  ;;  %v29_v25 = vld [vmem:[%s2762_s3 + $0x58] sm:$0xff]  ;;  %v30_v26 = vld [vmem:[%s2762_s3 + $0x60] sm:$0xff]  ;;  %v59_v27 = vand.u32 4294901760, %v26_v21  ;;  %v31_v28 = vld [vmem:[%s2762_s3 + $0x68] sm:$0xff]  ;;  %v2385_v31 = vand.u32 4294901760, %v2358_v22 }
   0x6   :  { %1972 = vmatpush3.bf16.msra.mxu0 %v2335_v12  ;;  %2116 = vmatpush3.bf16.msra.mxu1 %v2335_v12  ;;  %v32_v29 = vld [vmem:[%s2762_s3 + $0x70] sm:$0xff]  ;;  %v33_v30 = vld [vmem:[%s2762_s3 + $0x78] sm:$0xff]  ;;  %v2388_v32 = vpack.c.bf16 %v56_v20, %v53_v19  ;;  %v62_v33 = vand.u32 4294901760, %v27_v23  ;;  %v2392_v35 = vsub.f32 %v19_v2, %v38_v6  ;;  %v65_v36 = vand.u32 4294901760, %v28_v24 }
   0x7   :  { %1973 = vmatprep.subr.bf16.mxu0 %v2283_v0  ;;  %2117 = vmatprep.subr.bf16.mxu1 %v2283_v0  ;;  %v68_v37 = vand.u32 4294901760, %v29_v25  ;;  %v71_v38 = vand.u32 4294901760, %v30_v26  ;;  %v74_v39 = vand.u32 4294901760, %v31_v28  ;;  %v77_v40 = vand.u32 4294901760, %v32_v29 }
   0x8   :  { %v80_v41 = vand.u32 4294901760, %v33_v30  ;;  %v2399_v42 = vsub.f32 %v2358_v22, %v2385_v31  ;;  %v2401_v43 = vsub.f32 %v20_v3, %v41_v8  ;;  %v2404_v44 = vpack.c.bf16 %v62_v33, %v59_v27 }
   0x9   :  { %v128_v45 = vand.u32 4294901760, %v2390_v34  ;;  %v135_v46 = vand.u32 4294901760, %v2392_v35  ;;  %v2408_v47 = vsub.f32 %v21_v7, %v44_v9  ;;  %v2412_v48 = vsub.f32 %v22_v10, %v47_v14 }
   0xa   :  { %1975 = vmatpush3.bf16.msra.mxu0 %v2338_v13  ;;  %2119 = vmatpush3.bf16.msra.mxu1 %v2338_v13  ;;  %v2415_v49 = vpack.c.bf16 %v68_v37, %v65_v36  ;;  %v2417_v50 = vpack.c.bf16 %v74_v39, %v71_v38  ;;  %v2419_v51 = vpack.c.bf16 %v80_v41, %v77_v40  ;;  %v117_v52 = vand.u32 4294901760, %v2399_v42 }
   0xb   :  { %1976 = vmatprep.subr.bf16.mxu0 %v2283_v0  ;;  %2120 = vmatprep.subr.bf16.mxu1 %v2283_v0  ;;  %v142_v53 = vand.u32 4294901760, %v2401_v43  ;;  %v2423_v54 = vsub.f32 %v23_v11, %v50_v15  ;;  %v2425_v55 = vsub.f32 %v24_v16, %v53_v19  ;;  %v129_v56 = vsub.f32 %v2390_v34, %v128_v45 }
   0xc   :  { %v136_v57 = vsub.f32 %v2392_v35, %v135_v46  ;;  %v149_v58 = vand.u32 4294901760, %v2408_v47  ;;  %v2431_v59 = vsub.f32 %v25_v17, %v56_v20  ;;  %v156_v60 = vand.u32 4294901760, %v2412_v48 }
   0xd   :  { %v2436_v61 = vsub.f32 %v26_v21, %v59_v27  ;;  %v2438_v62 = vsub.f32 %v27_v23, %v62_v33  ;;  %v2440_v63 = vsub.f32 %v28_v24, %v65_v36  ;;  %v2443_v1 = vsub.f32 %v29_v25, %v68_v37 }
   0xe   :  { %1978 = vmatpush3.bf16.msra.mxu0 %v2350_v18  ;;  %2122 = vmatpush3.bf16.msra.mxu1 %v2350_v18  ;;  %v2445_v2 = vsub.f32 %v30_v26, %v71_v38  ;;  %v2447_v3 = vsub.f32 %v31_v28, %v74_v39  ;;  %v2449_v5 = vsub.f32 %v32_v29, %v77_v40  ;;  %v163_v8 = vand.u32 4294901760, %v2423_v54 }
   0xf   :  { %1979 = vmatprep.subr.bf16.mxu0 %v2283_v0  ;;  %2123 = vmatprep.subr.bf16.mxu1 %v2283_v0  ;;  %v118_v6 = vsub.f32 %v2399_v42, %v117_v52  ;;  %v143_v7 = vsub.f32 %v2401_v43, %v142_v53  ;;  %v2456_v9 = vsub.f32 %v33_v30, %v80_v41  ;;  %v130_v10 = vand.u32 4294901760, %v129_v56 }
  0x10   :  { %v137_v11 = vand.u32 4294901760, %v136_v57  ;;  %v150_v14 = vsub.f32 %v2408_v47, %v149_v58  ;;  %v170_v15 = vand.u32 4294901760, %v2425_v55  ;;  %v177_v16 = vand.u32 4294901760, %v2431_v59 }
  0x11   :  { %v184_v17 = vand.u32 4294901760, %v2436_v61  ;;  %v191_v19 = vand.u32 4294901760, %v2438_v62  ;;  %v198_v20 = vand.u32 4294901760, %v2440_v63  ;;  %v205_v21 = vand.u32 4294901760, %v2443_v1 }
  0x12   :  { %1981 = vmatpush3.bf16.msra.mxu0 %v2388_v32  ;;  %2125 = vmatpush3.bf16.msra.mxu1 %v2388_v32  ;;  %v212_v23 = vand.u32 4294901760, %v2445_v2  ;;  %v219_v24 = vand.u32 4294901760, %v2447_v3  ;;  %v226_v25 = vand.u32 4294901760, %v2449_v5  ;;  %v233_v26 = vand.u32 4294901760, %v2456_v9 }
  0x13   :  { %1982 = vmatprep.subr.bf16.mxu0 %v2283_v0  ;;  %2126 = vmatprep.subr.bf16.mxu1 %v2283_v0  ;;  %v2473_v27 = vpack.c.bf16 %v135_v46, %v128_v45  ;;  %v2475_v28 = vpack.c.bf16 %v149_v58, %v142_v53  ;;  %v2477_v29 = vpack.c.bf16 %v163_v8, %v156_v60  ;;  %v119_v39 = vand.u32 4294901760, %v118_v6 }
  0x14   :  { %v2480_v30 = vpack.c.bf16 %v177_v16, %v170_v15  ;;  %v2482_v33 = vpack.c.bf16 %v191_v19, %v184_v17  ;;  %v2484_v36 = vpack.c.bf16 %v205_v21, %v198_v20  ;;  %v2486_v37 = vpack.c.bf16 %v219_v24, %v212_v23 }
  0x15   :  { %v2489_v38 = vpack.c.bf16 %v233_v26, %v226_v25  ;;  %v157_v40 = vsub.f32 %v2412_v48, %v156_v60  ;;  %v2495_v41 = vpack.c.bf16 %v137_v11, %v130_v10  ;;  %v144_v45 = vand.u32 4294901760, %v143_v7 }
  0x16   :  { %1984 = vmatpush3.bf16.msra.mxu0 %v2404_v44  ;;  %2128 = vmatpush3.bf16.msra.mxu1 %v2404_v44  ;;  %v151_v46 = vand.u32 4294901760, %v150_v14  ;;  %v164_v53 = vsub.f32 %v2423_v54, %v163_v8  ;;  %v171_v56 = vsub.f32 %v2425_v55, %v170_v15  ;;  %v178_v6 = vsub.f32 %v2431_v59, %v177_v16 }
  0x17   :  { %1985 = vmatprep.subr.bf16.mxu0 %v2283_v0  ;;  %2129 = vmatprep.subr.bf16.mxu1 %v2283_v0  ;;  %v158_v58 = vand.u32 4294901760, %v157_v40  ;;  %v185_v11 = vsub.f32 %v2436_v61, %v184_v17  ;;  %v192_v14 = vsub.f32 %v2438_v62, %v191_v19  ;;  %v199_v15 = vsub.f32 %v2440_v63, %v198_v20 }
  0x18   :  { %v2503_v57 = vpack.c.bf16 %v151_v46, %v144_v45  ;;  %v165_v60 = vand.u32 4294901760, %v164_v53  ;;  %v172_v7 = vand.u32 4294901760, %v171_v56  ;;  %v179_v10 = vand.u32 4294901760, %v178_v6 }
  0x19   :  { %v193_v40 = vand.u32 4294901760, %v192_v14  ;;  %v206_v45 = vsub.f32 %v2443_v1, %v205_v21  ;;  %v213_v46 = vsub.f32 %v2445_v2, %v212_v23  ;;  %v200_v19 = vand.u32 4294901760, %v199_v15 }
  0x1a   :  { %1987 = vmatpush3.bf16.msra.mxu0 %v2415_v49  ;;  %2131 = vmatpush3.bf16.msra.mxu1 %v2415_v49  ;;  %v2510_v8 = vpack.c.bf16 %v165_v60, %v158_v58  ;;  %v2517_v16 = vpack.c.bf16 %v179_v10, %v172_v7  ;;  %v220_v20 = vsub.f32 %v2447_v3, %v219_v24 }
  0x1b   :  { %1988 = vmatprep.subr.bf16.mxu0 %v2283_v0  ;;  %2132 = vmatprep.subr.bf16.mxu1 %v2283_v0  ;;  %v207_v53 = vand.u32 4294901760, %v206_v45  ;;  %v227_v56 = vsub.f32 %v2449_v5, %v226_v25  ;;  %v214_v21 = vand.u32 4294901760, %v213_v46  ;;  %v234_v23 = vsub.f32 %v2456_v9, %v233_v26 }
  0x1c   :  { %v221_v60 = vand.u32 4294901760, %v220_v20  ;;  %v2544_v26 = vpack.c.bf16 %v2392_v35, %v2390_v34  ;;  %v2551_v10 = vpack.c.bf16 %v2408_v47, %v2401_v43  ;;  %v2559_v34 = vpack.c.bf16 %v2423_v54, %v2412_v48 }
  0x1d   :  { %v2529_v58 = vpack.c.bf16 %v207_v53, %v200_v19  ;;  %v228_v7 = vand.u32 4294901760, %v227_v56  ;;  %v235_v24 = vand.u32 4294901760, %v234_v23  ;;  %v2565_v35 = vpack.c.bf16 %v2431_v59, %v2425_v55 }
  0x1e   :  { %1990 = vmatpush3.bf16.msra.mxu0 %v2417_v50  ;;  %2134 = vmatpush3.bf16.msra.mxu1 %v2417_v50  ;;  %v2534_v6 = vpack.c.bf16 %v221_v60, %v214_v21  ;;  %v2571_v43 = vpack.c.bf16 %v2438_v62, %v2436_v61  ;;  %v2577_v47 = vpack.c.bf16 %v2443_v1, %v2440_v63 }
  0x1f   :  { %1991 = vmatprep.subr.bf16.mxu0 %v2283_v0  ;;  %2135 = vmatprep.subr.bf16.mxu1 %v2283_v0  ;;  %v2538_v25 = vpack.c.bf16 %v235_v24, %v228_v7  ;;  %v2583_v48 = vpack.c.bf16 %v2447_v3, %v2445_v2  ;;  %v2589_v54 = vpack.c.bf16 %v2456_v9, %v2449_v5 }
  0x22   :  { %1993 = vmatpush3.bf16.msra.mxu0 %v2419_v51  ;;  %2137 = vmatpush3.bf16.msra.mxu1 %v2419_v51 }
  0x23   :  { %1994 = vmatprep.subr.bf16.mxu0 %v2283_v0  ;;  %2138 = vmatprep.subr.bf16.mxu1 %v2283_v0 }
  0x25   :  { %1583 = vmatmul.mubr.f32.vlgmr.msra.gmra.mrb[0].mxu0 %v119_v39  ;;  %v186_v39 = vand.u32 4294901760, %v185_v11 }
  0x26   :  { %1996 = vmatpush3.bf16.msra.mxu0 %v2495_v41  ;;  %1617 = vmatprep.mubr.msk.f32.mxu0 %vm2284_vm0, %v2285_v4 }
  0x27   :  { %1997 = vmatprep.subr.bf16.mxu0 %v2283_v0  ;;  %v2523_v17 = vpack.c.bf16 %v193_v40, %v186_v39 }
  0x2a   :  { %1999 = vmatpush3.bf16.msra.mxu0 %v2503_v57 }
  0x2b   :  { %2000 = vmatprep.subr.bf16.mxu0 %v2283_v0 }
  0x2e   :  { %2002 = vmatpush3.bf16.msra.mxu0 %v2510_v8 }
  0x2f   :  { %2003 = vmatprep.subr.bf16.mxu0 %v2283_v0 }
  0x32   :  { %2005 = vmatpush3.bf16.msra.mxu0 %v2517_v16 }
  0x33   :  { %2006 = vmatprep.subr.bf16.mxu0 %v2283_v0 }
  0x36   :  { %2008 = vmatpush3.bf16.msra.mxu0 %v2523_v17 }
  0x37   :  { %2009 = vmatprep.subr.bf16.mxu0 %v2283_v0 }
  0x3a   :  { %2011 = vmatpush3.bf16.msra.mxu0 %v2529_v58 }
  0x3b   :  { %2012 = vmatprep.subr.bf16.mxu0 %v2283_v0 }
  0x3e   :  { %2014 = vmatpush3.bf16.msra.mxu0 %v2534_v6 }
  0x3f   :  { %2015 = vmatprep.subr.bf16.mxu0 %v2283_v0 }
  0x42   :  { %2017 = vmatpush3.bf16.msra.mxu0 %v2538_v25 }
  0x43   :  { %2018 = vmatprep.subr.bf16.mxu0 %v2283_v0 }
  0x45   :  { %1618 = vmatmul.mubr.f32.vlgmr.msra.gmra.mrb[0].mxu0 %v2385_v31 }
  0x46   :  { %2020 = vmatpush3.bf16.msra.mxu0 %v2544_v26  ;;  %1652 = vmatprep.mubr.msk.f32.mxu0 %vm2284_vm0, %v2285_v4 }
  0x47   :  { %2021 = vmatprep.subr.bf16.mxu0 %v2283_v0 }
  0x4a   :  { %2023 = vmatpush3.bf16.msra.mxu0 %v2551_v10 }
  0x4b   :  { %2024 = vmatprep.subr.bf16.mxu0 %v2283_v0 }
  0x4e   :  { %2026 = vmatpush3.bf16.msra.mxu0 %v2559_v34 }
  0x4f   :  { %2027 = vmatprep.subr.bf16.mxu0 %v2283_v0 }
  0x52   :  { %2029 = vmatpush3.bf16.msra.mxu0 %v2565_v35 }
  0x53   :  { %2030 = vmatprep.subr.bf16.mxu0 %v2283_v0 }
  0x56   :  { %2032 = vmatpush3.bf16.msra.mxu0 %v2571_v43 }
  0x57   :  { %2033 = vmatprep.subr.bf16.mxu0 %v2283_v0 }
  0x5a   :  { %2035 = vmatpush3.bf16.msra.mxu0 %v2577_v47 }
  0x5b   :  { %2036 = vmatprep.subr.bf16.mxu0 %v2283_v0 }
  0x5e   :  { %2038 = vmatpush3.bf16.msra.mxu0 %v2583_v48 }
  0x5f   :  { %2039 = vmatprep.subr.bf16.mxu0 %v2283_v0 }
  0x62   :  { %2041 = vmatpush3.bf16.msra.mxu0 %v2589_v54 }
  0x63   :  { %2042 = vmatprep.subr.bf16.mxu0 %v2283_v0 }
  0x65   :  { %1653 = vmatmul.mubr.f32.vlgmr.msra.gmra.mrb[0].mxu0 %v2399_v42 }
  0x66   :  { %2044 = vmatpush3.bf16.msra.mxu0 %v2335_v12  ;;  %1687 = vmatprep.mubr.msk.f32.mxu0 %vm2284_vm0, %v2285_v4 }
  0x67   :  { %2045 = vmatprep.subr.bf16.mxu0 %v2283_v0 }
  0x6a   :  { %2047 = vmatpush3.bf16.msra.mxu0 %v2338_v13 }
  0x6b   :  { %2048 = vmatprep.subr.bf16.mxu0 %v2283_v0 }
  0x6e   :  { %2050 = vmatpush3.bf16.msra.mxu0 %v2350_v18 }
  0x6f   :  { %2051 = vmatprep.subr.bf16.mxu0 %v2283_v0 }
  0x72   :  { %2053 = vmatpush3.bf16.msra.mxu0 %v2388_v32 }
  0x73   :  { %2054 = vmatprep.subr.bf16.mxu0 %v2283_v0 }
  0x76   :  { %2056 = vmatpush3.bf16.msra.mxu0 %v2404_v44 }
  0x77   :  { %2057 = vmatprep.subr.bf16.mxu0 %v2283_v0 }
  0x7a   :  { %2059 = vmatpush3.bf16.msra.mxu0 %v2415_v49 }
  0x7b   :  { %2060 = vmatprep.subr.bf16.mxu0 %v2283_v0 }
  0x7e   :  { %2062 = vmatpush3.bf16.msra.mxu0 %v2417_v50 }
  0x7f   :  { %2063 = vmatprep.subr.bf16.mxu0 %v2283_v0 }
  0x82   :  { %2065 = vmatpush3.bf16.msra.mxu0 %v2419_v51 }
  0x83   :  { %2066 = vmatprep.subr.bf16.mxu0 %v2283_v0 }
  0x85   :  { %1688 = vmatmul.mubr.f32.vlgmr.msra.gmra.mrb[0].mxu0 %v117_v52 }
  0x86   :  { %2068 = vmatpush3.bf16.msra.mxu0 %v2473_v27  ;;  %1722 = vmatprep.mubr.msk.f32.mxu0 %vm2284_vm0, %v2285_v4 }
  0x87   :  { %2069 = vmatprep.subr.bf16.mxu0 %v2283_v0 }
  0x8a   :  { %2071 = vmatpush3.bf16.msra.mxu0 %v2475_v28 }
  0x8b   :  { %2072 = vmatprep.subr.bf16.mxu0 %v2283_v0 }
  0x8e   :  { %2074 = vmatpush3.bf16.msra.mxu0 %v2477_v29 }
  0x8f   :  { %2075 = vmatprep.subr.bf16.mxu0 %v2283_v0 }
  0x92   :  { %2077 = vmatpush3.bf16.msra.mxu0 %v2480_v30 }
  0x93   :  { %2078 = vmatprep.subr.bf16.mxu0 %v2283_v0 }
  0x96   :  { %2080 = vmatpush3.bf16.msra.mxu0 %v2482_v33 }
  0x97   :  { %2081 = vmatprep.subr.bf16.mxu0 %v2283_v0 }
  0x9a   :  { %2083 = vmatpush3.bf16.msra.mxu0 %v2484_v36 }
  0x9b   :  { %2084 = vmatprep.subr.bf16.mxu0 %v2283_v0 }
  0x9e   :  { %2086 = vmatpush3.bf16.msra.mxu0 %v2486_v37 }
  0x9f   :  { %2087 = vmatprep.subr.bf16.mxu0 %v2283_v0 }
  0xa2   :  { %2089 = vmatpush3.bf16.msra.mxu0 %v2489_v38 }
  0xa3   :  { %2090 = vmatprep.subr.bf16.mxu0 %v2283_v0 }
  0xa5   :  { %1723 = vmatmul.mubr.f32.vlgmr.msra.gmra.mrb[0].mxu0 %v2385_v31 }
  0xa6   :  { %2092 = vmatpush3.bf16.msra.mxu0 %v2335_v12  ;;  %1757 = vmatprep.mubr.msk.f32.mxu0 %vm2284_vm0, %v2285_v4 }
  0xa7   :  { %2093 = vmatprep.subr.bf16.mxu0 %v2283_v0 }
  0xaa   :  { %2095 = vmatpush3.bf16.msra.mxu0 %v2338_v13 }
  0xab   :  { %2096 = vmatprep.subr.bf16.mxu0 %v2283_v0 }
  0xae   :  { %2098 = vmatpush3.bf16.msra.mxu0 %v2350_v18 }
  0xaf   :  { %2099 = vmatprep.subr.bf16.mxu0 %v2283_v0 }
  0xb2   :  { %2101 = vmatpush3.bf16.msra.mxu0 %v2388_v32 }
  0xb3   :  { %2102 = vmatprep.subr.bf16.mxu0 %v2283_v0 }
  0xb6   :  { %2104 = vmatpush3.bf16.msra.mxu0 %v2404_v44 }
  0xb7   :  { %2105 = vmatprep.subr.bf16.mxu0 %v2283_v0 }
  0xba   :  { %2107 = vmatpush3.bf16.msra.mxu0 %v2415_v49 }
  0xbb   :  { %2108 = vmatprep.subr.bf16.mxu0 %v2283_v0 }
  0xbe   :  { %2110 = vmatpush3.bf16.msra.mxu0 %v2417_v50 }
  0xbf   :  { %2111 = vmatprep.subr.bf16.mxu0 %v2283_v0 }
  0xc2   :  { %2113 = vmatpush3.bf16.msra.mxu0 %v2419_v51 }
  0xc5   :  { %1758 = vmatmul.mubr.f32.vlgmr.msra.gmra.mrb[0].mxu0 %v2385_v31  ;;  %v1344_v31 = vld [vmem:[%s2764_s1] ss:$0 sm:$0xff] }
 0x198   :  { %v671_v42 = vpop.f32.mrb[0].mxu0 }
 0x199   :  { %v675_v52 = vmul.f32 0.03125, %v671_v42  ;;  %v1759_v55 = vpop.f32.mrb[1].mxu0 }
 0x19b   :  { %v2653_v59 = vsub.f32 %v2358_v22, %v675_v52 }
 0x19d   :  { %v677_v61 = vmul.f32 %v2653_v59, %v2653_v59 }
 0x19f   :  { %v2657_v62 = vand.u32 4294901760, %v677_v61 }
 0x1a1   :  { %v760_v63 = vsub.f32 %v677_v61, %v2657_v62 }
 0x1a3   :  { %v761_v1 = vand.u32 4294901760, %v760_v63 }
 0x1a5   :  { %v762_v2 = vsub.f32 %v760_v63, %v761_v1 }
 0x1a7   :  { %v763_v3 = vand.u32 4294901760, %v762_v2 }
 0x1a9   :  { %1793 = vmatmul.mubr.f32.vlgmr.msra.gmra.mrb[0].mxu1 %v763_v3 }
 0x1aa   :  { %2140 = vmatpush3.bf16.msra.mxu1 %v2495_v41  ;;  %1827 = vmatprep.mubr.msk.f32.mxu1 %vm2284_vm0, %v2285_v4 }
 0x1ab   :  { %2141 = vmatprep.subr.bf16.mxu1 %v2283_v0 }
 0x1ae   :  { %2143 = vmatpush3.bf16.msra.mxu1 %v2503_v57 }
 0x1af   :  { %2144 = vmatprep.subr.bf16.mxu1 %v2283_v0 }
 0x1b2   :  { %2146 = vmatpush3.bf16.msra.mxu1 %v2510_v8 }
 0x1b3   :  { %2147 = vmatprep.subr.bf16.mxu1 %v2283_v0 }
 0x1b6   :  { %2149 = vmatpush3.bf16.msra.mxu1 %v2517_v16 }
 0x1b7   :  { %2150 = vmatprep.subr.bf16.mxu1 %v2283_v0 }
 0x1ba   :  { %2152 = vmatpush3.bf16.msra.mxu1 %v2523_v17 }
 0x1bb   :  { %2153 = vmatprep.subr.bf16.mxu1 %v2283_v0 }
 0x1be   :  { %2155 = vmatpush3.bf16.msra.mxu1 %v2529_v58 }
 0x1bf   :  { %2156 = vmatprep.subr.bf16.mxu1 %v2283_v0 }
 0x1c2   :  { %2158 = vmatpush3.bf16.msra.mxu1 %v2534_v6 }
 0x1c3   :  { %2159 = vmatprep.subr.bf16.mxu1 %v2283_v0 }
 0x1c6   :  { %2161 = vmatpush3.bf16.msra.mxu1 %v2538_v25 }
 0x1c7   :  { %2162 = vmatprep.subr.bf16.mxu1 %v2283_v0 }
 0x1c9   :  { %1828 = vmatmul.mubr.f32.vlgmr.msra.gmra.mrb[0].mxu1 %v2657_v62 }
 0x1ca   :  { %2164 = vmatpush3.bf16.msra.mxu1 %v2544_v26  ;;  %1862 = vmatprep.mubr.msk.f32.mxu1 %vm2284_vm0, %v2285_v4 }
 0x1cb   :  { %2165 = vmatprep.subr.bf16.mxu1 %v2283_v0 }
 0x1ce   :  { %2167 = vmatpush3.bf16.msra.mxu1 %v2551_v10 }
 0x1cf   :  { %2168 = vmatprep.subr.bf16.mxu1 %v2283_v0 }
 0x1d2   :  { %2170 = vmatpush3.bf16.msra.mxu1 %v2559_v34 }
 0x1d3   :  { %2171 = vmatprep.subr.bf16.mxu1 %v2283_v0 }
 0x1d6   :  { %2173 = vmatpush3.bf16.msra.mxu1 %v2565_v35 }
 0x1d7   :  { %2174 = vmatprep.subr.bf16.mxu1 %v2283_v0 }
 0x1da   :  { %2176 = vmatpush3.bf16.msra.mxu1 %v2571_v43 }
 0x1db   :  { %2177 = vmatprep.subr.bf16.mxu1 %v2283_v0 }
 0x1de   :  { %2179 = vmatpush3.bf16.msra.mxu1 %v2577_v47 }
 0x1df   :  { %2180 = vmatprep.subr.bf16.mxu1 %v2283_v0 }
 0x1e2   :  { %2182 = vmatpush3.bf16.msra.mxu1 %v2583_v48 }
 0x1e3   :  { %2183 = vmatprep.subr.bf16.mxu1 %v2283_v0 }
 0x1e6   :  { %2185 = vmatpush3.bf16.msra.mxu1 %v2589_v54 }
 0x1e7   :  { %2186 = vmatprep.subr.bf16.mxu1 %v2283_v0 }
 0x1e9   :  { %1863 = vmatmul.mubr.f32.vlgmr.msra.gmra.mrb[0].mxu1 %v760_v63 }
 0x1ea   :  { %2188 = vmatpush3.bf16.msra.mxu1 %v2335_v12  ;;  %1897 = vmatprep.mubr.msk.f32.mxu1 %vm2284_vm0, %v2285_v4 }
 0x1eb   :  { %2189 = vmatprep.subr.bf16.mxu1 %v2283_v0 }
 0x1ee   :  { %2191 = vmatpush3.bf16.msra.mxu1 %v2338_v13 }
 0x1ef   :  { %2192 = vmatprep.subr.bf16.mxu1 %v2283_v0 }
 0x1f2   :  { %2194 = vmatpush3.bf16.msra.mxu1 %v2350_v18 }
 0x1f3   :  { %2195 = vmatprep.subr.bf16.mxu1 %v2283_v0 }
 0x1f6   :  { %2197 = vmatpush3.bf16.msra.mxu1 %v2388_v32 }
 0x1f7   :  { %2198 = vmatprep.subr.bf16.mxu1 %v2283_v0 }
 0x1fa   :  { %2200 = vmatpush3.bf16.msra.mxu1 %v2404_v44 }
 0x1fb   :  { %2201 = vmatprep.subr.bf16.mxu1 %v2283_v0 }
 0x1fe   :  { %2203 = vmatpush3.bf16.msra.mxu1 %v2415_v49 }
 0x1ff   :  { %2204 = vmatprep.subr.bf16.mxu1 %v2283_v0 }
 0x202   :  { %2206 = vmatpush3.bf16.msra.mxu1 %v2417_v50 }
 0x203   :  { %2207 = vmatprep.subr.bf16.mxu1 %v2283_v0 }
 0x206   :  { %2209 = vmatpush3.bf16.msra.mxu1 %v2419_v51 }
 0x207   :  { %2210 = vmatprep.subr.bf16.mxu1 %v2283_v0 }
 0x209   :  { %1898 = vmatmul.mubr.f32.vlgmr.msra.gmra.mrb[0].mxu1 %v761_v1 }
 0x20a   :  { %2212 = vmatpush3.bf16.msra.mxu1 %v2473_v27  ;;  %1932 = vmatprep.mubr.msk.f32.mxu1 %vm2284_vm0, %v2285_v4 }
 0x20b   :  { %2213 = vmatprep.subr.bf16.mxu1 %v2283_v0 }
 0x20e   :  { %2215 = vmatpush3.bf16.msra.mxu1 %v2475_v28 }
 0x20f   :  { %2216 = vmatprep.subr.bf16.mxu1 %v2283_v0 }
 0x212   :  { %2218 = vmatpush3.bf16.msra.mxu1 %v2477_v29 }
 0x213   :  { %2219 = vmatprep.subr.bf16.mxu1 %v2283_v0 }
 0x216   :  { %2221 = vmatpush3.bf16.msra.mxu1 %v2480_v30 }
 0x217   :  { %2222 = vmatprep.subr.bf16.mxu1 %v2283_v0 }
 0x21a   :  { %2224 = vmatpush3.bf16.msra.mxu1 %v2482_v33 }
 0x21b   :  { %2225 = vmatprep.subr.bf16.mxu1 %v2283_v0 }
 0x21e   :  { %2227 = vmatpush3.bf16.msra.mxu1 %v2484_v36 }
 0x21f   :  { %2228 = vmatprep.subr.bf16.mxu1 %v2283_v0 }
 0x222   :  { %2230 = vmatpush3.bf16.msra.mxu1 %v2486_v37 }
 0x223   :  { %2231 = vmatprep.subr.bf16.mxu1 %v2283_v0 }
 0x226   :  { %2233 = vmatpush3.bf16.msra.mxu1 %v2489_v38 }
 0x227   :  { %2234 = vmatprep.subr.bf16.mxu1 %v2283_v0 }
 0x229   :  { %1933 = vmatmul.mubr.f32.vlgmr.msra.gmra.mrb[0].mxu1 %v2657_v62 }
 0x22a   :  { %2236 = vmatpush3.bf16.msra.mxu1 %v2335_v12  ;;  %1967 = vmatprep.mubr.msk.f32.mxu1 %vm2284_vm0, %v2285_v4 }
 0x22b   :  { %2237 = vmatprep.subr.bf16.mxu1 %v2283_v0 }
 0x22e   :  { %2239 = vmatpush3.bf16.msra.mxu1 %v2338_v13 }
 0x22f   :  { %2240 = vmatprep.subr.bf16.mxu1 %v2283_v0 }
 0x232   :  { %2242 = vmatpush3.bf16.msra.mxu1 %v2350_v18 }
 0x233   :  { %2243 = vmatprep.subr.bf16.mxu1 %v2283_v0 }
 0x236   :  { %2245 = vmatpush3.bf16.msra.mxu1 %v2388_v32 }
 0x237   :  { %2246 = vmatprep.subr.bf16.mxu1 %v2283_v0 }
 0x23a   :  { %2248 = vmatpush3.bf16.msra.mxu1 %v2404_v44 }
 0x23b   :  { %2249 = vmatprep.subr.bf16.mxu1 %v2283_v0 }
 0x23e   :  { %2251 = vmatpush3.bf16.msra.mxu1 %v2415_v49 }
 0x23f   :  { %2252 = vmatprep.subr.bf16.mxu1 %v2283_v0 }
 0x242   :  { %2254 = vmatpush3.bf16.msra.mxu1 %v2417_v50 }
 0x243   :  { %2255 = vmatprep.subr.bf16.mxu1 %v2283_v0  ;;  %v1345_v0 = vld [vmem:[%s2765_s2] ss:$0 sm:$0xff] }
 0x246   :  { %2257 = vmatpush3.bf16.msra.mxu1 %v2419_v51 }
 0x249   :  { %1968 = vmatmul.mubr.f32.vlgmr.msra.gmra.mrb[0].mxu1 %v2657_v62 }
 0x31c   :  { %v1315_v4 = vpop.f32.mrb[0].mxu1 }
 0x31d   :  { %v1319_v12 = vmul.f32 0.03125, %v1315_v4  ;;  %v1969_v13 = vpop.f32.mrb[1].mxu1 }
 0x31f   :  { %v1320_v18 = vadd.f32 1e-05, %v1319_v12 }
 0x321   :  { %2281 = vrsqrt.f32 %v1320_v18 }
 0x32b   :  { %v2282_v22 = vpop.eup %2281 }
 0x32c   :  { %v1322_v32 = vmul.f32 %v2282_v22, %v2653_v59 }
 0x32e   :  { %v1330_v44 = vmul.f32 %v1344_v31, %v1322_v32 }
 0x330   :  { %v1338_v49 = vadd.f32 %v1345_v0, %v1330_v44 }
 0x332   :  { %1339 = vst [vmem:[%s2766_s4] sm:$0xf] %v1338_v49 }

</bundles_post_ra>
